<compile_context>
chip_gen: v5e
topology: v5e:2x2
jax: 0.10.0
libtpu: 0.0.40
codegen_flags: <defaults>
</compile_context>

<pallas_src>
import math

import jax
import jax.numpy as jnp
from jax.experimental import pallas as pl
from jax.experimental.pallas import tpu as pltpu


def _choose_tile(n, cap, min_grid=1):
    """Largest multiple of 128 that divides n (n is already 128-aligned),
    capped at `cap` and, when requested, capped so the lane grid has at least
    `min_grid` steps (keeps both v7x TensorCores busy when B == 1)."""
    limit = min(cap, n)
    if min_grid > 1 and n >= min_grid * 128:
        limit = min(limit, n // min_grid)
    t = max((limit // 128) * 128, 128)
    while n % t != 0:
        t -= 128
    return t


def _choose_chunk(tile_n, target):
    """Lane sub-slab processed per inner-loop step (bounds vreg pressure)."""
    if tile_n <= target:
        return tile_n
    c = max((target // 128) * 128, 128)
    while c > 128 and tile_n % c != 0:
        c -= 128
    return c


def _make_motion_head_kernel(layer_meta, final_row, c_last, tile_n, chunk_n):
    n_chunks = tile_n // chunk_n

    def kernel(x_ref, p_ref, out_ref):
        pk = p_ref[...]                                   # tiny packed params

        # Unpack weights and pre-broadcast biases ONCE per grid step (outside
        # the chunk loop): JAX does not CSE broadcast_in_dim, so re-emitting
        # these per chunk would put filler ops on the saturated VALU slot.
        layers = []
        for (r0, co, ci) in layer_meta:
            w_cols = [pk[r0:r0 + co, c:c + 1] for c in range(ci)]     # (co, 1)
            b_full = jnp.broadcast_to(pk[r0:r0 + co, ci:ci + 1], (co, chunk_n))
            layers.append((w_cols, b_full))
        # Final conv weight is stored pre-transposed as a (c_last, 1) column so
        # it broadcasts along lanes with no in-kernel transpose.
        wf_col = pk[final_row:final_row + c_last, 0:1]

        def compute(col0):
            h = x_ref[:, pl.ds(col0, chunk_n)].astype(jnp.float32)  # (C_in, L)
            # TODO(synk): a stride-0 sublane-broadcast load for the first layer
            # (x_ref[pl.ds(c, co, stride=0)]) would push the 1->co splat into
            # the idle vld slots, but pl.ds rejects stride < 1 in current JAX.
            for w_cols, b_full in layers:                 # relu(W'x + b')
                acc = w_cols[0] * h[0:1, :]
                for c in range(1, len(w_cols)):
                    acc = acc + w_cols[c] * h[c:c + 1, :]
                h = jnp.maximum(acc + b_full, 0.0)
            # Final 1x1 conv: sublane-dense multiply (VPU) + cross-sublane
            # reduce (XLU) instead of a 1/8-sublane-dense broadcast-FMA chain.
            logits = jnp.sum(h * wf_col, axis=0, keepdims=True)     # (1, L)
            # sigmoid(x) == 0.5*tanh(x/2) + 0.5 (exact); tanh runs on the EUP,
            # avoiding a full-precision VALU divide on sparse vregs.
            out_ref[:, pl.ds(col0, chunk_n)] = (
                0.5 * jnp.tanh(0.5 * logits) + 0.5).astype(out_ref.dtype)

        if n_chunks == 1:
            compute(0)
        else:
            def body(ci_, carry):
                compute(pl.multiple_of(ci_ * chunk_n, chunk_n))
                return carry
            # Partial unroll: LLO scheduling visibility without the register-
            # pressure cliff of fully unrolling 32-64 chunk bodies.
            jax.lax.fori_loop(0, n_chunks, body, 0, unroll=min(n_chunks, 8))

    return kernel


def _fold_bn(layer):
    """Fold inference-mode BatchNorm into the preceding bias-free 1x1 conv."""
    scale = layer["gamma"] / jnp.sqrt(layer["var"] + layer["eps"])
    w = layer["w"] * scale[:, None]                        # (C_out, C_in)
    b = (layer["beta"] - layer["mean"] * scale)[:, None]   # (C_out, 1)
    return w, b


def _pack_params(params):
    """Fold BN and pack every layer's weight/bias into one tiny (R, C) array:
    one pallas_call input, one VMEM buffer, one constant block index."""
    blocks, layer_meta = [], []
    r0, max_c = 0, 1
    for layer in params["hidden"]:
        w, b = _fold_bn(layer)                             # (co, ci), (co, 1)
        co, ci = w.shape
        blocks.append(jnp.concatenate([w, b], axis=1))     # (co, ci + 1)
        layer_meta.append((r0, co, ci))
        r0 += co
        max_c = max(max_c, ci + 1)
    w_final = params["w_final"]                            # (1, c_last)
    c_last = w_final.shape[1]
    blocks.append(w_final.T)                               # stored as a column
    final_row = r0
    packed = jnp.concatenate(
        [jnp.pad(blk, ((0, 0), (0, max_c - blk.shape[1]))) for blk in blocks],
        axis=0)
    return packed, layer_meta, final_row, c_last


def motion_head_forward(feat, params, *, tile_cap=32768, chunk_target=512):
    """feat: (B, C_in, N) float32 -> (B, 1, N), matching MotionHead.forward (eval)."""
    B, c_in, n = feat.shape
    packed, layer_meta, final_row, c_last = _pack_params(params)

    # Keep the big spatial axis lane-dense: pad ragged N up to a multiple of
    # 128 (slice the result) instead of one masked, unaligned full-extent block.
    n_pad = n if n % 128 == 0 else ((n + 127) // 128) * 128
    x = feat if n_pad == n else jnp.pad(feat, ((0, 0), (0, 0), (0, n_pad - n)))

    tile_n = _choose_tile(n_pad, tile_cap, min_grid=2 if B == 1 else 1)
    chunk_n = _choose_chunk(tile_n, chunk_target)
    grid = (B, n_pad // tile_n)

    x_spec = pl.BlockSpec((pl.Squeezed(), c_in, tile_n), lambda b, j: (b, 0, j))
    p_spec = pl.BlockSpec(packed.shape, lambda b, j: (0, 0))
    out_spec = pl.BlockSpec((pl.Squeezed(), 1, tile_n), lambda b, j: (b, 0, j))

    out = pl.pallas_call(
        _make_motion_head_kernel(layer_meta, final_row, c_last, tile_n, chunk_n),
        out_shape=jax.ShapeDtypeStruct((B, 1, n_pad), feat.dtype),
        grid_spec=pltpu.PrefetchScalarGridSpec(
            num_scalar_prefetch=0,
            grid=grid,
            in_specs=[x_spec, p_spec],
            out_specs=out_spec,
        ),
        compiler_params=pltpu.CompilerParams(
            dimension_semantics=("parallel", "parallel"),
            # Double-buffered footprint is ~1.5 MiB even at tile_n = 32768 —
            # far inside every generation's VMEM (v7x: 64 MiB per TC).
            vmem_limit_bytes=32 * 1024 * 1024,
        ),
    )(x, packed)
    return out if n_pad == n else out[:, :, :n]


def init_motion_head_params(key, in_channel, mlp, eps=1e-5):
    """Deterministic init. Conv weights stored as (C_out, C_in) (PyTorch
    (C_out, C_in, 1, 1) squeezed). BN uses non-trivial gamma/beta/running stats
    so the eval-mode folding is actually exercised."""
    hidden = []
    last = in_channel
    for out_c in mlp:
        key, kw, kg, kb, km, kv = jax.random.split(key, 6)
        bound = 1.0 / math.sqrt(last)
        hidden.append(dict(
            w=jax.random.uniform(kw, (out_c, last), jnp.float32, -bound, bound),
            gamma=jax.random.uniform(kg, (out_c,), jnp.float32, 0.5, 1.5),
            beta=0.1 * jax.random.normal(kb, (out_c,), jnp.float32),
            mean=0.1 * jax.random.normal(km, (out_c,), jnp.float32),
            var=jax.random.uniform(kv, (out_c,), jnp.float32, 0.5, 1.5),
            eps=eps,
        ))
        last = out_c
    key, kf = jax.random.split(key)
    bound = 1.0 / math.sqrt(last)
    w_final = jax.random.uniform(kf, (1, last), jnp.float32, -bound, bound)
    return {"hidden": hidden, "w_final": w_final}


def _reference_forward(feat, params):
    """Pure-JAX reference of MotionHead.forward in eval mode."""
    h = feat.astype(jnp.float32)
    for layer in params["hidden"]:
        h = jnp.einsum("oc,bcn->bon", layer["w"], h)       # 1x1 conv, no bias
        inv_std = 1.0 / jnp.sqrt(layer["var"] + layer["eps"])
        h = (h - layer["mean"][None, :, None]) * inv_std[None, :, None]
        h = h * layer["gamma"][None, :, None] + layer["beta"][None, :, None]
        h = jnp.maximum(h, 0.0)
    logits = jnp.einsum("oc,bcn->bon", params["w_final"], h)
    return 1.0 / (1.0 + jnp.exp(-logits))                  # (B, 1, N)


if __name__ == "__main__":
    key = jax.random.PRNGKey(0)

    # Case 1: B=2, C_in=4, N=256, mlp=(8, 8) — 128-aligned N, batch-parallel.
    k_params, k_x, key = jax.random.split(key, 3)
    params = init_motion_head_params(k_params, 4, (8, 8))
    feat = jax.random.normal(k_x, (2, 4, 256), jnp.float32)
    out = jax.block_until_ready(motion_head_forward(feat, params))
    ref = _reference_forward(feat, params)
    assert out.shape == (2, 1, 256), out.shape
    assert jnp.allclose(out, ref, atol=1e-5, rtol=1e-5), \
        float(jnp.max(jnp.abs(out - ref)))

    # Case 2: B=1, ragged N=200, mlp=(16, 8) — exercises the pad/slice path and
    # the >=2 grid-step split that keeps both v7x TensorCores busy.
    k_params2, k_x2, key = jax.random.split(key, 3)
    params2 = init_motion_head_params(k_params2, 4, (16, 8))
    feat2 = jax.random.normal(k_x2, (1, 4, 200), jnp.float32)
    out2 = jax.block_until_ready(motion_head_forward(feat2, params2))
    ref2 = _reference_forward(feat2, params2)
    assert out2.shape == (1, 1, 200), out2.shape
    assert jnp.allclose(out2, ref2, atol=1e-5, rtol=1e-5), \
        float(jnp.max(jnp.abs(out2 - ref2)))

    print("KERNEL_OK")
</pallas_src>

<mosaic_0001>
module attributes {stable_mosaic.version = 11 : i64} {
  func.func @kernel(%arg0: i32, %arg1: i32, %arg2: memref<1x4x256xf32, #tpu.memory_space<vmem>>, %arg3: memref<24x9xf32, #tpu.memory_space<vmem>>, %arg4: memref<1x1x256xf32, #tpu.memory_space<vmem>>) attributes {dimension_semantics = [#tpu.dimension_semantics<parallel>, #tpu.dimension_semantics<parallel>], iteration_bounds = array<i64: 2, 1>, scalar_prefetch = 0 : i64, scratch_operands = 0 : i64, tpu.core_type = #tpu.core_type<tc>, window_params = [{transform_indices = @transform_0, window_bounds = array<i64: 1, 4, 256>}, {pipeline_mode = #tpu.pipeline_mode<synchronous>, transform_indices = @transform_1, window_bounds = array<i64: 24, 9>}, {transform_indices = @transform_2, window_bounds = array<i64: 1, 1, 256>}]} {
    %c0 = arith.constant 0 : index
    %c0_0 = arith.constant 0 : index
    %0 = vector.load %arg3[%c0, %c0_0] : memref<24x9xf32, #tpu.memory_space<vmem>>, vector<24x9xf32>
    %1 = vector.extract_strided_slice %0 {offsets = [0, 0], sizes = [8, 1], strides = [1, 1]} : vector<24x9xf32> to vector<8x1xf32>
    %2 = vector.extract_strided_slice %0 {offsets = [0, 1], sizes = [8, 1], strides = [1, 1]} : vector<24x9xf32> to vector<8x1xf32>
    %3 = vector.extract_strided_slice %0 {offsets = [0, 2], sizes = [8, 1], strides = [1, 1]} : vector<24x9xf32> to vector<8x1xf32>
    %4 = vector.extract_strided_slice %0 {offsets = [0, 3], sizes = [8, 1], strides = [1, 1]} : vector<24x9xf32> to vector<8x1xf32>
    %5 = vector.extract_strided_slice %0 {offsets = [0, 4], sizes = [8, 1], strides = [1, 1]} : vector<24x9xf32> to vector<8x1xf32>
    %6 = vector.shape_cast %5 : vector<8x1xf32> to vector<8x1xf32>
    %7 = vector.broadcast %6 : vector<8x1xf32> to vector<8x256xf32>
    %8 = vector.extract_strided_slice %0 {offsets = [8, 0], sizes = [8, 1], strides = [1, 1]} : vector<24x9xf32> to vector<8x1xf32>
    %9 = vector.extract_strided_slice %0 {offsets = [8, 1], sizes = [8, 1], strides = [1, 1]} : vector<24x9xf32> to vector<8x1xf32>
    %10 = vector.extract_strided_slice %0 {offsets = [8, 2], sizes = [8, 1], strides = [1, 1]} : vector<24x9xf32> to vector<8x1xf32>
    %11 = vector.extract_strided_slice %0 {offsets = [8, 3], sizes = [8, 1], strides = [1, 1]} : vector<24x9xf32> to vector<8x1xf32>
    %12 = vector.extract_strided_slice %0 {offsets = [8, 4], sizes = [8, 1], strides = [1, 1]} : vector<24x9xf32> to vector<8x1xf32>
    %13 = vector.extract_strided_slice %0 {offsets = [8, 5], sizes = [8, 1], strides = [1, 1]} : vector<24x9xf32> to vector<8x1xf32>
    %14 = vector.extract_strided_slice %0 {offsets = [8, 6], sizes = [8, 1], strides = [1, 1]} : vector<24x9xf32> to vector<8x1xf32>
    %15 = vector.extract_strided_slice %0 {offsets = [8, 7], sizes = [8, 1], strides = [1, 1]} : vector<24x9xf32> to vector<8x1xf32>
    %16 = vector.extract_strided_slice %0 {offsets = [8, 8], sizes = [8, 1], strides = [1, 1]} : vector<24x9xf32> to vector<8x1xf32>
    %17 = vector.shape_cast %16 : vector<8x1xf32> to vector<8x1xf32>
    %18 = vector.broadcast %17 : vector<8x1xf32> to vector<8x256xf32>
    %19 = vector.extract_strided_slice %0 {offsets = [16, 0], sizes = [8, 1], strides = [1, 1]} : vector<24x9xf32> to vector<8x1xf32>
    %c0_1 = arith.constant 0 : index
    %c0_2 = arith.constant 0 : index
    %c0_3 = arith.constant 0 : index
    %20 = vector.load %arg2[%c0_1, %c0_2, %c0_3] : memref<1x4x256xf32, #tpu.memory_space<vmem>>, vector<1x4x256xf32>
    %21 = vector.shape_cast %20 : vector<1x4x256xf32> to vector<4x256xf32>
    %22 = vector.extract_strided_slice %21 {offsets = [0, 0], sizes = [1, 256], strides = [1, 1]} : vector<4x256xf32> to vector<1x256xf32>
    %23 = vector.broadcast %1 : vector<8x1xf32> to vector<8x256xf32>
    %24 = vector.broadcast %22 : vector<1x256xf32> to vector<8x256xf32>
    %25 = arith.mulf %23, %24 : vector<8x256xf32>
    %26 = vector.extract_strided_slice %21 {offsets = [1, 0], sizes = [1, 256], strides = [1, 1]} : vector<4x256xf32> to vector<1x256xf32>
    %27 = vector.broadcast %2 : vector<8x1xf32> to vector<8x256xf32>
    %28 = vector.broadcast %26 : vector<1x256xf32> to vector<8x256xf32>
    %29 = arith.mulf %27, %28 : vector<8x256xf32>
    %30 = arith.addf %25, %29 : vector<8x256xf32>
    %31 = vector.extract_strided_slice %21 {offsets = [2, 0], sizes = [1, 256], strides = [1, 1]} : vector<4x256xf32> to vector<1x256xf32>
    %32 = vector.broadcast %3 : vector<8x1xf32> to vector<8x256xf32>
    %33 = vector.broadcast %31 : vector<1x256xf32> to vector<8x256xf32>
    %34 = arith.mulf %32, %33 : vector<8x256xf32>
    %35 = arith.addf %30, %34 : vector<8x256xf32>
    %36 = vector.extract_strided_slice %21 {offsets = [3, 0], sizes = [1, 256], strides = [1, 1]} : vector<4x256xf32> to vector<1x256xf32>
    %37 = vector.broadcast %4 : vector<8x1xf32> to vector<8x256xf32>
    %38 = vector.broadcast %36 : vector<1x256xf32> to vector<8x256xf32>
    %39 = arith.mulf %37, %38 : vector<8x256xf32>
    %40 = arith.addf %35, %39 : vector<8x256xf32>
    %41 = arith.addf %40, %7 : vector<8x256xf32>
    %cst = arith.constant 0.000000e+00 : f32
    %42 = vector.broadcast %cst : f32 to vector<8x256xf32>
    %43 = arith.maximumf %41, %42 : vector<8x256xf32>
    %44 = vector.extract_strided_slice %43 {offsets = [0, 0], sizes = [1, 256], strides = [1, 1]} : vector<8x256xf32> to vector<1x256xf32>
    %45 = vector.broadcast %8 : vector<8x1xf32> to vector<8x256xf32>
    %46 = vector.broadcast %44 : vector<1x256xf32> to vector<8x256xf32>
    %47 = arith.mulf %45, %46 : vector<8x256xf32>
    %48 = vector.extract_strided_slice %43 {offsets = [1, 0], sizes = [1, 256], strides = [1, 1]} : vector<8x256xf32> to vector<1x256xf32>
    %49 = vector.broadcast %9 : vector<8x1xf32> to vector<8x256xf32>
    %50 = vector.broadcast %48 : vector<1x256xf32> to vector<8x256xf32>
    %51 = arith.mulf %49, %50 : vector<8x256xf32>
    %52 = arith.addf %47, %51 : vector<8x256xf32>
    %53 = vector.extract_strided_slice %43 {offsets = [2, 0], sizes = [1, 256], strides = [1, 1]} : vector<8x256xf32> to vector<1x256xf32>
    %54 = vector.broadcast %10 : vector<8x1xf32> to vector<8x256xf32>
    %55 = vector.broadcast %53 : vector<1x256xf32> to vector<8x256xf32>
    %56 = arith.mulf %54, %55 : vector<8x256xf32>
    %57 = arith.addf %52, %56 : vector<8x256xf32>
    %58 = vector.extract_strided_slice %43 {offsets = [3, 0], sizes = [1, 256], strides = [1, 1]} : vector<8x256xf32> to vector<1x256xf32>
    %59 = vector.broadcast %11 : vector<8x1xf32> to vector<8x256xf32>
    %60 = vector.broadcast %58 : vector<1x256xf32> to vector<8x256xf32>
    %61 = arith.mulf %59, %60 : vector<8x256xf32>
    %62 = arith.addf %57, %61 : vector<8x256xf32>
    %63 = vector.extract_strided_slice %43 {offsets = [4, 0], sizes = [1, 256], strides = [1, 1]} : vector<8x256xf32> to vector<1x256xf32>
    %64 = vector.broadcast %12 : vector<8x1xf32> to vector<8x256xf32>
    %65 = vector.broadcast %63 : vector<1x256xf32> to vector<8x256xf32>
    %66 = arith.mulf %64, %65 : vector<8x256xf32>
    %67 = arith.addf %62, %66 : vector<8x256xf32>
    %68 = vector.extract_strided_slice %43 {offsets = [5, 0], sizes = [1, 256], strides = [1, 1]} : vector<8x256xf32> to vector<1x256xf32>
    %69 = vector.broadcast %13 : vector<8x1xf32> to vector<8x256xf32>
    %70 = vector.broadcast %68 : vector<1x256xf32> to vector<8x256xf32>
    %71 = arith.mulf %69, %70 : vector<8x256xf32>
    %72 = arith.addf %67, %71 : vector<8x256xf32>
    %73 = vector.extract_strided_slice %43 {offsets = [6, 0], sizes = [1, 256], strides = [1, 1]} : vector<8x256xf32> to vector<1x256xf32>
    %74 = vector.broadcast %14 : vector<8x1xf32> to vector<8x256xf32>
    %75 = vector.broadcast %73 : vector<1x256xf32> to vector<8x256xf32>
    %76 = arith.mulf %74, %75 : vector<8x256xf32>
    %77 = arith.addf %72, %76 : vector<8x256xf32>
    %78 = vector.extract_strided_slice %43 {offsets = [7, 0], sizes = [1, 256], strides = [1, 1]} : vector<8x256xf32> to vector<1x256xf32>
    %79 = vector.broadcast %15 : vector<8x1xf32> to vector<8x256xf32>
    %80 = vector.broadcast %78 : vector<1x256xf32> to vector<8x256xf32>
    %81 = arith.mulf %79, %80 : vector<8x256xf32>
    %82 = arith.addf %77, %81 : vector<8x256xf32>
    %83 = arith.addf %82, %18 : vector<8x256xf32>
    %cst_4 = arith.constant 0.000000e+00 : f32
    %84 = vector.broadcast %cst_4 : f32 to vector<8x256xf32>
    %85 = arith.maximumf %83, %84 : vector<8x256xf32>
    %86 = vector.broadcast %19 : vector<8x1xf32> to vector<8x256xf32>
    %87 = arith.mulf %85, %86 : vector<8x256xf32>
    %cst_5 = arith.constant dense<0.000000e+00> : vector<256xf32>
    %88 = vector.multi_reduction <add>, %87, %cst_5 [0] : vector<8x256xf32> to vector<256xf32>
    %89 = vector.shape_cast %88 : vector<256xf32> to vector<1x256xf32>
    %cst_6 = arith.constant 5.000000e-01 : f32
    %90 = vector.broadcast %cst_6 : f32 to vector<1x256xf32>
    %91 = arith.mulf %90, %89 : vector<1x256xf32>
    %92 = math.tanh %91 : vector<1x256xf32>
    %cst_7 = arith.constant 5.000000e-01 : f32
    %93 = vector.broadcast %cst_7 : f32 to vector<1x256xf32>
    %94 = arith.mulf %93, %92 : vector<1x256xf32>
    %cst_8 = arith.constant 5.000000e-01 : f32
    %95 = vector.broadcast %cst_8 : f32 to vector<1x256xf32>
    %96 = arith.addf %94, %95 : vector<1x256xf32>
    %c0_9 = arith.constant 0 : index
    %c0_10 = arith.constant 0 : index
    %c0_11 = arith.constant 0 : index
    %97 = vector.load %arg4[%c0_9, %c0_10, %c0_11] : memref<1x1x256xf32, #tpu.memory_space<vmem>>, vector<1x1x256xf32>
    %98 = vector.shape_cast %97 : vector<1x1x256xf32> to vector<1x256xf32>
    %99 = vector.shape_cast %96 : vector<1x256xf32> to vector<1x1x256xf32>
    tpu.vector_store %arg4[%c0_9, %c0_10, %c0_11], %99 {strides = array<i32>} : memref<1x1x256xf32, #tpu.memory_space<vmem>>, vector<1x1x256xf32>,
    return
  }
  func.func @transform_0(%arg0: i32, %arg1: i32) -> (i32, i32, i32) {
    %c0_i32 = arith.constant 0 : i32
    %c0_i32_0 = arith.constant 0 : i32
    return %arg0, %c0_i32, %arg1 : i32, i32, i32
  }
  func.func @transform_1(%arg0: i32, %arg1: i32) -> (i32, i32) {
    %c0_i32 = arith.constant 0 : i32
    %c0_i32_0 = arith.constant 0 : i32
    %c0_i32_1 = arith.constant 0 : i32
    return %c0_i32, %c0_i32_0 : i32, i32
  }
  func.func @transform_2(%arg0: i32, %arg1: i32) -> (i32, i32, i32) {
    %c0_i32 = arith.constant 0 : i32
    %c0_i32_0 = arith.constant 0 : i32
    return %arg0, %c0_i32, %arg1 : i32, i32, i32
  }
}

</mosaic_0001>

<bundles_post_ra>
// kernel: tpu_custom_call.1
= control target key start
LH: loop header
LB: loop body
LE: loop exit
PB: predicated region body
PF: predicated region fallthrough
CT: control target
= control target key end

     0   :  { %7 = vsyncpa [#allocation3], 0  ;;  %s766_s0 = inlined_call_operand.vmem [shape: f32[2,4,256], index: 0, kind: input, shape index: {}]   ;;  %s767_s1 = inlined_call_operand.vmem [shape: f32[24,9], index: 1, kind: input, shape index: {}]   ;;  %s768_s2 = inlined_call_operand.hbm [shape: f32[2,1,256], index: 2, kind: output, shape index: {}]  }
   0x1   :  { %9 = vsyncpa [#allocation3 + $0x1], 0  ;;  %s660_s9 = smov 0   ;;  %s662_s10 = smov 0  }
   0x2   :  { %s664_s11 = smov 0   ;;  %s666_s12 = smov 0  }
   0x3   :  { %s668_s13 = smov 0   ;;  %s670_s14 = smov 0  }
   0x4 LB: > { %s459_s15 = sadd.s32 4294967295, %s634_s14   ;;  %s460_s16 = sadd.s32 4294967294, %s634_s14   ;;  %s634_s14 = sphi %s670_s14, %s15_s14   ;;  %s630_s13 = sphi %s668_s13, %s775_s13   ;;  %s626_s12 = sphi %s666_s12, %s774_s12   ;;  %s622_s11 = sphi %s664_s11, %s773_s11   ;;  %s618_s10 = sphi %s662_s10, %s772_s10   ;;  %s614_s9 = sphi %s660_s9, %s771_s9  }
   0x5   : > { %s27_s17 = sadd.s32 1, %s630_s13  ;;  %s85_s18 = sadd.s32 1, %s622_s11 }
   0x6   : > { %p29_p0 = scmp.ge.s32.totalorder %s27_s17, 2  ;;  %p95_p1 = scmp.ne.s32.totalorder %s622_s11, %s618_s10 }
   0x7   : > { %p96_p2 = scmp.eq.s32.totalorder %s459_s15, 1  ;;  %p101_p3 = scmp.ne.s32.totalorder %s618_s10, %s614_s9 }
   0x8   : > { %s777_s17 = smov (%p29_p0, %s27_s17), 0  ;;  %p102_p5 = scmp.eq.s32.totalorder %s460_s16, 1 }
   0x9   : > { %p700_p4 = por %p96_p2, %p95_p1  ;;  %s80_s20 = ssub.s32 %s630_s13, %s777_s17 }
   0xa   : > { %p463_p6 = scmp.ge.s32.totalorder %s634_s14, 1  ;;  %p83_p7 = scmp.eq.s32.totalorder %s80_s20, 0 }
   0xb   : > { %p707_p8 = por %p102_p5, %p101_p3  ;;  %p136_p9 = scmp.lt.s32.totalorder %s634_s14, 3 }
   0xc   : > { %s713_s22 = scalar_select %p83_p7, %s622_s11, %s85_s18  }
   0xd   : > { %p137_p10 = pnand %p463_p6, %p136_p9 }
   0xe   : > { %p163_p11 = scmp.lt.s32.totalorder (!%p137_p10), %s626_s12, 1  ;;  %s159_s6 = sand.u32 (!%p137_p10), 1, %s618_s10  }
   0xf   : > { %140 = sbr.rel (%p137_p10) target bundleno = 217 (0xd9), region = 28  ;;  %s464_s7 = sshll.u32 (!%p137_p10), %s159_s6, 1 }
  0x10   : > { %s468_s8 = sshll.u32 (!%p137_p10), %s626_s12, 1  ;;  %s161_s20 = scalar_lea.vmem (!%p137_p10), [#allocation2], %s464_s7 }
  0x11   : > { %s379_s18 = scalar_lea.hbm (!%p137_p10), %s768_s2, %s468_s8  ;;  %s381_s23 = sshll.u32 (!%p137_p10), %s161_s20, 4  ;;  %s382_s23 = int_to_ptr.vmem [resolvable:$true] %s381_s23 }
  0x12   : > { %s383_s24 = sshll.u32 (!%p137_p10), %s379_s18, 4  ;;  %s384_s24 = int_to_ptr.hbm [resolvable:$true] %s383_s24 }
  0x13   : > { %s570_s25 = sshra.s32 (!%p137_p10), %s384_s24, 4  ;;  %s571_s25 = int_to_ptr.hbm [resolvable:$true] %s570_s25 }
  0x14   : > { %v173_v0 = vld [vmem:[%s767_s1] sm:$0xff]  ;;  %v636_v1 = vmov 2   ;;  %v637_v2 = vmov 0   ;;  %v638_v3 = vmov 4   ;;  %v639_v4 = vmov 3   ;;  %v174_v6 = vld [vmem:[%s767_s1 + $0x8] sm:$0xff]  ;;  %p577_p1 = scmp.lt.s32.totalorder %s571_s25, %s768_s2 }
  0x15   : > { %538 = vset.pattern.permute.xlu1 %v636_v1  ;;  %536 = vset.pattern.permute.xlu0 %v637_v2  ;;  %v640_v5 = vmov 1   ;;  %v641_v7 = vmov 8   ;;  %v642_v8 = vmov 5   ;;  %v643_v9 = vmov 6   ;;  %v175_v11 = vld [vmem:[%s767_s1 + $0x10] sm:$0xff]  ;;  %s164_s29 = scalar_select %p163_p11, %s626_s12, 1 }
  0x16   : > { %215 = vperm.xlu1 %538, %v173_v0   ;;  %188 = vperm.xlu0 %536, %v173_v0   ;;  %v644_v10 = vmov 7   ;;  %vm358_vm0 = vcmask 1040384   ;;  %s367_s12 = scalar_lea.sflag [#allocation3], %s159_s6  ;;  %s572_s26 = scalar_lea.hbm %s571_s25, 2 }
  0x17   : > { %540 = vset.pattern.permute.xlu2 %v638_v3  ;;  %s471_s30 = sshll.u32 %s164_s29, 3  ;;  %p573_p12 = scmp.ne.s32.totalorder %s571_s25, %s572_s26 }
  0x18   : > { %178 = vperm.xlu2 %540, %v173_v0   ;;  %s170_s5 = scalar_lea.vmem %s766_s0, %s471_s30  ;;  %s576_s29 = scalar_lea.hbm %s768_s2, 4 }
  0x19   : > { %v186_v15 = vld [vmem:[%s170_s5] sm:$0xff]  ;;  %p574_p13 = pnand %p573_p12, %p700_p4  ;;  %p578_p2 = scmp.lt.s32.totalorder %s576_s29, %s572_s26 }
  0x1a   : > { %v192_v16 = vperm.slane %v186_v15, 0  ;;  %v193_v17 = vperm.slane %v186_v15, 4  ;;  %v204_v18 = vperm.slane %v186_v15, 1  ;;  %v205_v19 = vperm.slane %v186_v15, 5 }
  0x1b   : > { %v218_v20 = vperm.slane %v186_v15, 2  ;;  %v219_v21 = vperm.slane %v186_v15, 6  ;;  %v232_v22 = vperm.slane %v186_v15, 3  ;;  %v233_v23 = vperm.slane %v186_v15, 7  ;;  %p575_p0 = pneg %p574_p13  ;;  %p579_p3 = por %p578_p2, %p577_p1 }
  0x1c   : > { %v196_v25 = vperm.slane %v192_v16, 0  ;;  %v197_v26 = vperm.slane %v193_v17, 0  ;;  %v208_v27 = vperm.slane %v204_v18, 1  ;;  %v209_v28 = vperm.slane %v205_v19, 1 }
  0x1d   : > { %v222_v29 = vperm.slane %v218_v20, 2  ;;  %v223_v30 = vperm.slane %v219_v21, 2  ;;  %v236_v32 = vperm.slane %v232_v22, 3  ;;  %v237_v33 = vperm.slane %v233_v23, 3  ;;  %p580_p5 = pnand %p579_p3, %p575_p0 }
  0x1e   : > { %539 = vset.pattern.permute.xlu1 %v639_v4  ;;  %537 = vset.pattern.permute.xlu0 %v640_v5 }
  0x1f   : > { %229 = vperm.xlu1 %539, %v173_v0   ;;  %201 = vperm.xlu0 %537, %v173_v0  }
  0x20   : > { %541 = vset.pattern.permute.xlu2 %v637_v2 }
  0x21   : > { %247 = vperm.xlu2 %541, %v174_v6  }
  0x27   : > { %542 = vset.pattern.permute.xlu1 %v640_v5  ;;  %544 = vset.pattern.permute.xlu0 %v639_v4 }
  0x28   : > { %255 = vperm.xlu1 %542, %v174_v6   ;;  %275 = vperm.xlu0 %544, %v174_v6  }
  0x29   : > { %543 = vset.pattern.permute.xlu2 %v636_v1 }
  0x2a   : > { %265 = vperm.xlu2 %543, %v174_v6  }
  0x30   : > { %545 = vset.pattern.permute.xlu1 %v638_v3  ;;  %549 = vset.pattern.permute.xlu0 %v641_v7 }
  0x31   : > { %285 = vperm.xlu1 %545, %v174_v6   ;;  %183 = vperm.xlu0 %549, %v174_v6  }
  0x32   : > { %546 = vset.pattern.permute.xlu2 %v642_v8 }
  0x33   : > { %295 = vperm.xlu2 %546, %v174_v6  }
  0x39   : > { %547 = vset.pattern.permute.xlu1 %v643_v9  ;;  %551 = vset.pattern.permute.xlu0 %v637_v2 }
  0x3a   : > { %305 = vperm.xlu1 %547, %v174_v6  }
  0x3b   : > { %548 = vset.pattern.permute.xlu2 %v644_v10 }
  0x3c   : > { %315 = vperm.xlu2 %548, %v174_v6  }
  0x42   : > { %550 = vset.pattern.permute.xlu1 %v637_v2 }
  0x43   : > { %330 = vperm.xlu1 %550, %v175_v11  }
  0x72   : > { %v179_v12 = vpop.permute.xlu2 %178 }
  0x7b   : > { %v248_v24 = vpop.permute.xlu2 %247 }
  0x84   : > { %v266_v47 = vpop.permute.xlu2 %265 }
  0x88   : > { %v216_v13 = vpop.permute.xlu1 %215  ;;  %v189_v14 = vpop.permute.xlu0 %188 }
  0x89   : > { %v198_v35 = vmul.f32 %v196_v25, %v189_v14  ;;  %v199_v36 = vmul.f32 %v197_v26, %v189_v14  ;;  %v224_v39 = vmul.f32 %v222_v29, %v216_v13  ;;  %v225_v40 = vmul.f32 %v223_v30, %v216_v13 }
  0x8d   : > { %v296_v63 = vpop.permute.xlu2 %295 }
  0x91   : > { %v230_v31 = vpop.permute.xlu1 %229  ;;  %v202_v34 = vpop.permute.xlu0 %201 }
  0x92   : > { %v210_v37 = vmul.f32 %v208_v27, %v202_v34  ;;  %v211_v38 = vmul.f32 %v209_v28, %v202_v34  ;;  %v238_v43 = vmul.f32 %v236_v32, %v230_v31  ;;  %v239_v44 = vmul.f32 %v237_v33, %v230_v31 }
  0x94   : > { %v212_v41 = vadd.f32 %v210_v37, %v198_v35  ;;  %v213_v42 = vadd.f32 %v211_v38, %v199_v36 }
  0x96   : > { %v226_v45 = vadd.f32 %v224_v39, %v212_v41  ;;  %v227_v46 = vadd.f32 %v225_v40, %v213_v42  ;;  %v316_v30 = vpop.permute.xlu2 %315 }
  0x98   : > { %v240_v48 = vadd.f32 %v238_v43, %v226_v45  ;;  %v241_v49 = vadd.f32 %v239_v44, %v227_v46 }
  0x9a   : > { %v242_v50 = vadd.f32 %v240_v48, %v179_v12  ;;  %v243_v51 = vadd.f32 %v241_v49, %v179_v12  ;;  %v256_v52 = vpop.permute.xlu1 %255  ;;  %v276_v6 = vpop.permute.xlu0 %275 }
  0x9c   : > { %v244_v53 = vmax.f32 %v242_v50, 0.0  ;;  %v245_v54 = vmax.f32 %v243_v51, 0.0 }
  0x9e   : > { %v250_v55 = vperm.slane %v244_v53, 0  ;;  %v251_v56 = vperm.slane %v245_v54, 0  ;;  %v258_v57 = vperm.slane %v244_v53, 1  ;;  %v259_v58 = vperm.slane %v245_v54, 1 }
  0x9f   : > { %v268_v0 = vperm.slane %v244_v53, 2  ;;  %v269_v1 = vperm.slane %v245_v54, 2  ;;  %v278_v2 = vperm.slane %v244_v53, 3  ;;  %v279_v3 = vperm.slane %v245_v54, 3 }
  0xa0   : > { %v252_v59 = vmul.f32 %v250_v55, %v248_v24  ;;  %v253_v60 = vmul.f32 %v251_v56, %v248_v24  ;;  %v260_v61 = vmul.f32 %v258_v57, %v256_v52  ;;  %v261_v62 = vmul.f32 %v259_v58, %v256_v52 }
  0xa1   : > { %v270_v8 = vmul.f32 %v268_v0, %v266_v47  ;;  %v271_v9 = vmul.f32 %v269_v1, %v266_v47  ;;  %v288_v10 = vperm.slane %v244_v53, 4  ;;  %v289_v11 = vperm.slane %v245_v54, 4 }
  0xa2   : > { %v262_v4 = vadd.f32 %v260_v61, %v252_v59  ;;  %v263_v5 = vadd.f32 %v261_v62, %v253_v60  ;;  %v280_v14 = vmul.f32 %v278_v2, %v276_v6  ;;  %v281_v15 = vmul.f32 %v279_v3, %v276_v6 }
  0xa3   : > { %v286_v7 = vpop.permute.xlu1 %285  ;;  %v298_v16 = vperm.slane %v244_v53, 5  ;;  %v299_v17 = vperm.slane %v245_v54, 5  ;;  %v318_v22 = vperm.slane %v244_v53, 7  ;;  %v319_v23 = vperm.slane %v245_v54, 7  ;;  %v184_v40 = vpop.permute.xlu0 %183 }
  0xa4   : > { %v272_v12 = vadd.f32 %v270_v8, %v262_v4  ;;  %v273_v13 = vadd.f32 %v271_v9, %v263_v5  ;;  %v290_v20 = vmul.f32 %v288_v10, %v286_v7  ;;  %v291_v21 = vmul.f32 %v289_v11, %v286_v7 }
  0xa5   : > { %v300_v26 = vmul.f32 %v298_v16, %v296_v63  ;;  %v301_v27 = vmul.f32 %v299_v17, %v296_v63  ;;  %v308_v28 = vperm.slane %v244_v53, 6  ;;  %v309_v29 = vperm.slane %v245_v54, 6 }
  0xa6   : > { %v282_v18 = vadd.f32 %v280_v14, %v272_v12  ;;  %v283_v19 = vadd.f32 %v281_v15, %v273_v13  ;;  %v320_v36 = vmul.f32 %v318_v22, %v316_v30  ;;  %v321_v37 = vmul.f32 %v319_v23, %v316_v30 }
  0xa7   : > { %v361_v4 = vlaneseq }
  0xa8   : > { %v292_v24 = vadd.f32 %v290_v20, %v282_v18  ;;  %v293_v25 = vadd.f32 %v291_v21, %v283_v19 }
  0xa9   : > { %vm363_vm1 = vcmp.lt.s32.totalorder %v361_v4, 256 }
  0xaa   : > { %v302_v32 = vadd.f32 %v300_v26, %v292_v24  ;;  %v303_v33 = vadd.f32 %v301_v27, %v293_v25 }
  0xac   : > { %v306_v31 = vpop.permute.xlu1 %305 }
  0xad   : > { %v310_v34 = vmul.f32 %v308_v28, %v306_v31  ;;  %v311_v35 = vmul.f32 %v309_v29, %v306_v31 }
  0xaf   : > { %v312_v38 = vadd.f32 %v310_v34, %v302_v32  ;;  %v313_v39 = vadd.f32 %v311_v35, %v303_v33 }
  0xb1   : > { %v322_v41 = vadd.f32 %v320_v36, %v312_v38  ;;  %v323_v42 = vadd.f32 %v321_v37, %v313_v39 }
  0xb3   : > { %v324_v43 = vadd.f32 %v322_v41, %v184_v40  ;;  %v325_v44 = vadd.f32 %v323_v42, %v184_v40 }
  0xb5   : > { %v326_v45 = vmax.f32 %v324_v43, 0.0  ;;  %v327_v46 = vmax.f32 %v325_v44, 0.0  ;;  %v331_v47 = vpop.permute.xlu1 %330 }
  0xb7   : > { %v333_v48 = vmul.f32 %v331_v47, %v326_v45  ;;  %v334_v49 = vmul.f32 %v331_v47, %v327_v46 }
  0xb9   : > { %v335_v50 = vrot.slane %v333_v48, 4  ;;  %v341_v51 = vrot.slane %v334_v49, 4 }
  0xbb   : > { %v336_v52 = vadd.f32 %v335_v50, %v333_v48  ;;  %v342_v53 = vadd.f32 %v341_v51, %v334_v49 }
  0xbd   : > { %v337_v54 = vrot.slane %v336_v52, 2  ;;  %v343_v55 = vrot.slane %v342_v53, 2 }
  0xbf   : > { %v338_v56 = vadd.f32 %v337_v54, %v336_v52  ;;  %v344_v57 = vadd.f32 %v343_v55, %v342_v53 }
  0xc1   : > { %v339_v58 = vrot.slane %v338_v56, 1  ;;  %v345_v59 = vrot.slane %v344_v57, 1 }
  0xc3   : > { %v340_v60 = vadd.f32 %v339_v58, %v338_v56  ;;  %v346_v61 = vadd.f32 %v345_v59, %v344_v57 }
  0xc5   : > { %v347_v62 = vmul.f32 0.5, %v340_v60  ;;  %v348_v63 = vmul.f32 0.5, %v346_v61 }
  0xc7   : > { %552 = vtanh.f32 %v347_v62 }
  0xc8   : > { %554 = vtanh.f32 %v348_v63 }
  0xcd   : > { %v553_v0 = vpop.eup %552 }
  0xce   : > { %v555_v1 = vpop.eup %554  ;;  %v351_v2 = vmul.f32 0.5, %v553_v0 }
  0xcf   : > { %v352_v3 = vmul.f32 0.5, %v555_v1 }
  0xd0   : > { %v353_v6 = vadd.f32 0.5, %v351_v2 }
  0xd1   : > { %v354_v5 = vadd.f32 0.5, %v352_v3 }
  0xd3   : > { %v357_v7 = vrot.slane %v354_v5, 7 }
  0xd5   : > { %v359_v8 = vsel %vm358_vm0, %v353_v6, %v357_v7 }
  0xd6   : > { %365 = vst.msk [vmem:[%s161_s20] sm:$0x3] %vm363_vm1, %v359_v8 }
  0xd7   : > { %583 = shalt.err (!%p580_p5)
}
  0xd8   : > { %472 = dma.vmem_to_hbm [thread:$0]  (%p700_p4), %s382_s23, 32, %s384_s24, %s367_s12  }
  0xd9 PF: > { %p478_p6 = scmp.ge.s32.totalorder %s634_s14, 2  ;;  %s395_s4 = sand.u32 1, %s614_s9  }
  0xda   : > { %s396_s5 = scalar_lea.sflag [#allocation3], %s395_s4 }
  0xdb   : > { %p475_p7 = pnand %p478_p6, %p707_p8 }
  0xdd   : > { %p476_p9 = pneg %p475_p7 }
  0xdf   : > { %609 = dma.done.wait (%p476_p9), %s396_s5, 32  }
  0xe0   : > { %611 = vsyncadd (%p476_p9), %s396_s5, 4294967264  ;;  %s15_s14 = sadd.s32 1, %s634_s14   ;;  %s771_s9 = smov %s618_s10 }
  0xe1   : > { %p12_p10 = scmp.ge.s32.totalorder %s15_s14, 4   ;;  %s772_s10 = smov %s622_s11 }
  0xe2   : > { %s773_s11 = smov %s713_s22  ;;  %s774_s12 = smov %s630_s13 }
  0xe3   : > { %s775_s13 = smov %s777_s17  ;;  %14 = sbr.rel (!%p12_p10) target bundleno = 4 (0x4), region = 63 }
  0xe8   :  { %402 = vsyncpa [#allocation3], 1 }
  0xe9   :  { %404 = vsyncpa [#allocation3 + $0x1], 1 }

</bundles_post_ra>
